<compile_context>
chip_gen: v6e
topology: v6e:2x2x1
jax: 0.10.0
libtpu: 0.0.40
codegen_flags: <defaults>
</compile_context>

<pallas_src>
import numpy as np
import jax
import jax.numpy as jnp
from jax import lax
from jax.experimental import pallas as pl
from jax.experimental.pallas import tpu as pltpu

EPS = 1e-5


# ------------------------------ Pallas kernel ------------------------------ #

def _downconv_bn_relu_kernel(q_ref, w_ref, g_ref, b_ref, o_ref):
    # q_ref: (N, Ho+1, Wo+1, 4*Cin) f32  parity-folded padded input (last dim = ph,pw,ci)
    # w_ref: (4, 4*Cin, Cout)       bf16 per-tap weight matrices (tap = dh*2+dw)
    # g_ref, b_ref: (1, Cout)       f32  BN gamma / beta
    # o_ref: (N*Ho*Wo, Cout)        f32  fused conv + BN + ReLU output
    n, hq, wq, c4 = q_ref.shape
    ho, wo = hq - 1, wq - 1
    m, cout = o_ref.shape

    q = q_ref[...]
    acc = None
    for t in range(4):                         # unrolled: the 4 shifted 2x2 taps
        dh, dw = divmod(t, 2)
        tap = q[:, dh:dh + ho, dw:dw + wo, :].reshape(m, c4).astype(jnp.bfloat16)
        part = jnp.dot(tap, w_ref[t], preferred_element_type=jnp.float32)
        acc = part if acc is None else acc + part

    # Fused BatchNorm (training mode: biased batch statistics) + ReLU epilogue.
    mean = jnp.mean(acc, axis=0, keepdims=True)
    cen = acc - mean
    var = jnp.mean(cen * cen, axis=0, keepdims=True)
    inv = lax.rsqrt(var + EPS)
    o_ref[...] = jnp.maximum(cen * (inv * g_ref[...]) + b_ref[...], 0.0)


def _fused_downconv(q, wm, gamma_row, beta_row, m, cout):
    n, hq, wq, c4 = q.shape
    return pl.pallas_call(
        _downconv_bn_relu_kernel,
        out_shape=jax.ShapeDtypeStruct((m, cout), jnp.float32),
        grid=(1,),
        in_specs=[
            pl.BlockSpec((n, hq, wq, c4), lambda i: (0, 0, 0, 0)),
            pl.BlockSpec((4, c4, cout), lambda i: (0, 0, 0)),
            pl.BlockSpec((1, cout), lambda i: (0, 0)),
            pl.BlockSpec((1, cout), lambda i: (0, 0)),
        ],
        out_specs=pl.BlockSpec((m, cout), lambda i: (0, 0)),
        compiler_params=pltpu.CompilerParams(dimension_semantics=("arbitrary",)),
    )(q, wm, gamma_row, beta_row)


# ------------------------------ public wrapper ------------------------------ #

def downconv_forward(x_nchw, weight, gamma, beta):
    """x_nchw: (N, Cin, H, W); weight: (Cout, Cin, 4, 4) PyTorch Conv2d layout."""
    n, cin, h, w = x_nchw.shape
    cout = weight.shape[0]
    ho, wo = h // 2, w // 2

    # NHWC + pad=1, then fold the stride-2 sub-pixel parity into the channel dim:
    # (N, 2*(Ho+1), 2*(Wo+1), Cin) -> (N, Ho+1, Wo+1, 4*Cin), last dim order (ph, pw, ci).
    x = jnp.transpose(x_nchw, (0, 2, 3, 1))
    xp = jnp.pad(x, ((0, 0), (1, 1), (1, 1), (0, 0)))
    q = (xp.reshape(n, ho + 1, 2, wo + 1, 2, cin)
           .transpose(0, 1, 3, 2, 4, 5)
           .reshape(n, ho + 1, wo + 1, 4 * cin))

    # Per-tap weight matrices: wm[dh*2+dw, (ph,pw,ci), co] = w[co, ci, 2*dh+ph, 2*dw+pw]
    wm = (weight.reshape(cout, cin, 2, 2, 2, 2)
                .transpose(2, 4, 3, 5, 1, 0)
                .reshape(4, 4 * cin, cout)
                .astype(jnp.bfloat16))

    out = _fused_downconv(q, wm,
                          gamma.astype(jnp.float32).reshape(1, cout),
                          beta.astype(jnp.float32).reshape(1, cout),
                          n * ho * wo, cout)
    return jnp.transpose(out.reshape(n, ho, wo, cout), (0, 3, 1, 2))   # -> NCHW


# --------------------------- pure-JAX reference ----------------------------- #

def downconv_ref(x_nchw, weight, gamma, beta):
    y = lax.conv_general_dilated(x_nchw, weight, (2, 2), ((1, 1), (1, 1)),
                                 dimension_numbers=("NCHW", "OIHW", "NCHW"))
    mean = jnp.mean(y, axis=(0, 2, 3), keepdims=True)
    var = jnp.mean((y - mean) ** 2, axis=(0, 2, 3), keepdims=True)
    yn = (y - mean) * lax.rsqrt(var + EPS)
    return jnp.maximum(yn * gamma.reshape(1, -1, 1, 1) + beta.reshape(1, -1, 1, 1), 0.0)


# ---------------------------------- main ------------------------------------ #

if __name__ == "__main__":
    key = jax.random.PRNGKey(0)
    kx, kw, kg, kb = jax.random.split(key, 4)

    N, Cin, Cout, H, W = 2, 16, 32, 16, 16
    x = jax.random.normal(kx, (N, Cin, H, W), jnp.float32)
    weight = jax.random.normal(kw, (Cout, Cin, 4, 4), jnp.float32) * 0.05
    gamma = 1.0 + 0.1 * jax.random.normal(kg, (Cout,), jnp.float32)
    beta = 0.1 * jax.random.normal(kb, (Cout,), jnp.float32)

    out = jax.jit(downconv_forward)(x, weight, gamma, beta)
    out = jax.block_until_ready(out)
    assert out.shape == (N, Cout, H // 2, W // 2), out.shape

    ref = jax.block_until_ready(downconv_ref(x, weight, gamma, beta))
    np.testing.assert_allclose(np.asarray(out), np.asarray(ref), rtol=2e-2, atol=2e-2)

    print("KERNEL_OK")
</pallas_src>

<mosaic_0001>
module attributes {stable_mosaic.version = 11 : i64} {
  func.func @_downconv_bn_relu_kernel(%arg0: i32, %arg1: memref<2x9x9x64xf32, #tpu.memory_space<vmem>>, %arg2: memref<4x64x32xbf16, #tpu.memory_space<vmem>>, %arg3: memref<1x32xf32, #tpu.memory_space<vmem>>, %arg4: memref<1x32xf32, #tpu.memory_space<vmem>>, %arg5: memref<128x32xf32, #tpu.memory_space<vmem>>) attributes {dimension_semantics = [#tpu.dimension_semantics<arbitrary>], iteration_bounds = array<i64: 1>, scalar_prefetch = 0 : i64, scratch_operands = 0 : i64, tpu.core_type = #tpu.core_type<tc>, window_params = [{pipeline_mode = #tpu.pipeline_mode<synchronous>, transform_indices = @transform_0, window_bounds = array<i64: 2, 9, 9, 64>}, {pipeline_mode = #tpu.pipeline_mode<synchronous>, transform_indices = @transform_1, window_bounds = array<i64: 4, 64, 32>}, {pipeline_mode = #tpu.pipeline_mode<synchronous>, transform_indices = @transform_2, window_bounds = array<i64: 1, 32>}, {pipeline_mode = #tpu.pipeline_mode<synchronous>, transform_indices = @transform_3, window_bounds = array<i64: 1, 32>}, {pipeline_mode = #tpu.pipeline_mode<synchronous>, transform_indices = @transform_4, window_bounds = array<i64: 128, 32>}]} {
    %c0 = arith.constant 0 : index
    %c0_0 = arith.constant 0 : index
    %c0_1 = arith.constant 0 : index
    %c0_2 = arith.constant 0 : index
    %0 = vector.load %arg1[%c0, %c0_0, %c0_1, %c0_2] : memref<2x9x9x64xf32, #tpu.memory_space<vmem>>, vector<2x9x9x64xf32>
    %1 = vector.extract_strided_slice %0 {offsets = [0, 0, 0, 0], sizes = [2, 8, 8, 64], strides = [1, 1, 1, 1]} : vector<2x9x9x64xf32> to vector<2x8x8x64xf32>
    %2 = vector.shape_cast %1 : vector<2x8x8x64xf32> to vector<128x64xf32>
    %3 = arith.truncf %2 : vector<128x64xf32> to vector<128x64xbf16>
    %c0_3 = arith.constant 0 : index
    %c0_4 = arith.constant 0 : index
    %c0_5 = arith.constant 0 : index
    %4 = vector.load %arg2[%c0_3, %c0_4, %c0_5] : memref<4x64x32xbf16, #tpu.memory_space<vmem>>, vector<1x64x32xbf16>
    %5 = vector.shape_cast %4 : vector<1x64x32xbf16> to vector<64x32xbf16>
    %cst = arith.constant dense<0.000000e+00> : vector<128x32xf32>
    %6 = tpu.matmul %3, %5, %cst {dimension_numbers = #tpu.dot_dimension_numbers<[1], [0], [0], [1], [0, 0, 1, 1], [], []>} : vector<128x64xbf16>, vector<64x32xbf16>, vector<128x32xf32> -> vector<128x32xf32>
    %7 = vector.extract_strided_slice %0 {offsets = [0, 0, 1, 0], sizes = [2, 8, 8, 64], strides = [1, 1, 1, 1]} : vector<2x9x9x64xf32> to vector<2x8x8x64xf32>
    %8 = vector.shape_cast %7 : vector<2x8x8x64xf32> to vector<128x64xf32>
    %9 = arith.truncf %8 : vector<128x64xf32> to vector<128x64xbf16>
    %c1 = arith.constant 1 : index
    %c0_6 = arith.constant 0 : index
    %c0_7 = arith.constant 0 : index
    %10 = vector.load %arg2[%c1, %c0_6, %c0_7] : memref<4x64x32xbf16, #tpu.memory_space<vmem>>, vector<1x64x32xbf16>
    %11 = vector.shape_cast %10 : vector<1x64x32xbf16> to vector<64x32xbf16>
    %cst_8 = arith.constant dense<0.000000e+00> : vector<128x32xf32>
    %12 = tpu.matmul %9, %11, %cst_8 {dimension_numbers = #tpu.dot_dimension_numbers<[1], [0], [0], [1], [0, 0, 1, 1], [], []>} : vector<128x64xbf16>, vector<64x32xbf16>, vector<128x32xf32> -> vector<128x32xf32>
    %13 = arith.addf %6, %12 : vector<128x32xf32>
    %14 = vector.extract_strided_slice %0 {offsets = [0, 1, 0, 0], sizes = [2, 8, 8, 64], strides = [1, 1, 1, 1]} : vector<2x9x9x64xf32> to vector<2x8x8x64xf32>
    %15 = vector.shape_cast %14 : vector<2x8x8x64xf32> to vector<128x64xf32>
    %16 = arith.truncf %15 : vector<128x64xf32> to vector<128x64xbf16>
    %c2 = arith.constant 2 : index
    %c0_9 = arith.constant 0 : index
    %c0_10 = arith.constant 0 : index
    %17 = vector.load %arg2[%c2, %c0_9, %c0_10] : memref<4x64x32xbf16, #tpu.memory_space<vmem>>, vector<1x64x32xbf16>
    %18 = vector.shape_cast %17 : vector<1x64x32xbf16> to vector<64x32xbf16>
    %cst_11 = arith.constant dense<0.000000e+00> : vector<128x32xf32>
    %19 = tpu.matmul %16, %18, %cst_11 {dimension_numbers = #tpu.dot_dimension_numbers<[1], [0], [0], [1], [0, 0, 1, 1], [], []>} : vector<128x64xbf16>, vector<64x32xbf16>, vector<128x32xf32> -> vector<128x32xf32>
    %20 = arith.addf %13, %19 : vector<128x32xf32>
    %21 = vector.extract_strided_slice %0 {offsets = [0, 1, 1, 0], sizes = [2, 8, 8, 64], strides = [1, 1, 1, 1]} : vector<2x9x9x64xf32> to vector<2x8x8x64xf32>
    %22 = vector.shape_cast %21 : vector<2x8x8x64xf32> to vector<128x64xf32>
    %23 = arith.truncf %22 : vector<128x64xf32> to vector<128x64xbf16>
    %c3 = arith.constant 3 : index
    %c0_12 = arith.constant 0 : index
    %c0_13 = arith.constant 0 : index
    %24 = vector.load %arg2[%c3, %c0_12, %c0_13] : memref<4x64x32xbf16, #tpu.memory_space<vmem>>, vector<1x64x32xbf16>
    %25 = vector.shape_cast %24 : vector<1x64x32xbf16> to vector<64x32xbf16>
    %cst_14 = arith.constant dense<0.000000e+00> : vector<128x32xf32>
    %26 = tpu.matmul %23, %25, %cst_14 {dimension_numbers = #tpu.dot_dimension_numbers<[1], [0], [0], [1], [0, 0, 1, 1], [], []>} : vector<128x64xbf16>, vector<64x32xbf16>, vector<128x32xf32> -> vector<128x32xf32>
    %27 = arith.addf %20, %26 : vector<128x32xf32>
    %cst_15 = arith.constant dense<0.000000e+00> : vector<32xf32>
    %28 = vector.multi_reduction <add>, %27, %cst_15 [0] : vector<128x32xf32> to vector<32xf32>
    %29 = vector.shape_cast %28 : vector<32xf32> to vector<1x32xf32>
    %cst_16 = arith.constant 1.280000e+02 : f32
    %30 = vector.broadcast %cst_16 : f32 to vector<1x32xf32>
    %31 = arith.divf %29, %30 : vector<1x32xf32>
    %32 = vector.broadcast %31 : vector<1x32xf32> to vector<128x32xf32>
    %33 = arith.subf %27, %32 : vector<128x32xf32>
    %34 = arith.mulf %33, %33 : vector<128x32xf32>
    %cst_17 = arith.constant dense<0.000000e+00> : vector<32xf32>
    %35 = vector.multi_reduction <add>, %34, %cst_17 [0] : vector<128x32xf32> to vector<32xf32>
    %36 = vector.shape_cast %35 : vector<32xf32> to vector<1x32xf32>
    %cst_18 = arith.constant 1.280000e+02 : f32
    %37 = vector.broadcast %cst_18 : f32 to vector<1x32xf32>
    %38 = arith.divf %36, %37 : vector<1x32xf32>
    %cst_19 = arith.constant 9.99999974E-6 : f32
    %39 = vector.broadcast %cst_19 : f32 to vector<1x32xf32>
    %40 = arith.addf %38, %39 : vector<1x32xf32>
    %41 = math.rsqrt %40 : vector<1x32xf32>
    %c0_20 = arith.constant 0 : index
    %c0_21 = arith.constant 0 : index
    %42 = vector.load %arg3[%c0_20, %c0_21] : memref<1x32xf32, #tpu.memory_space<vmem>>, vector<1x32xf32>
    %43 = arith.mulf %41, %42 : vector<1x32xf32>
    %44 = vector.broadcast %43 : vector<1x32xf32> to vector<128x32xf32>
    %45 = arith.mulf %33, %44 : vector<128x32xf32>
    %c0_22 = arith.constant 0 : index
    %c0_23 = arith.constant 0 : index
    %46 = vector.load %arg4[%c0_22, %c0_23] : memref<1x32xf32, #tpu.memory_space<vmem>>, vector<1x32xf32>
    %47 = vector.broadcast %46 : vector<1x32xf32> to vector<128x32xf32>
    %48 = arith.addf %45, %47 : vector<128x32xf32>
    %cst_24 = arith.constant 0.000000e+00 : f32
    %49 = vector.broadcast %cst_24 : f32 to vector<128x32xf32>
    %50 = arith.maximumf %48, %49 : vector<128x32xf32>
    %c0_25 = arith.constant 0 : index
    %c0_26 = arith.constant 0 : index
    %51 = vector.load %arg5[%c0_25, %c0_26] : memref<128x32xf32, #tpu.memory_space<vmem>>, vector<128x32xf32>
    tpu.vector_store %arg5[%c0_25, %c0_26], %50 {strides = array<i32>} : memref<128x32xf32, #tpu.memory_space<vmem>>, vector<128x32xf32>,
    return
  }
  func.func @transform_0(%arg0: i32) -> (i32, i32, i32, i32) {
    %c0_i32 = arith.constant 0 : i32
    %c0_i32_0 = arith.constant 0 : i32
    %c0_i32_1 = arith.constant 0 : i32
    %c0_i32_2 = arith.constant 0 : i32
    %c0_i32_3 = arith.constant 0 : i32
    return %c0_i32, %c0_i32_0, %c0_i32_1, %c0_i32_2 : i32, i32, i32, i32
  }
  func.func @transform_1(%arg0: i32) -> (i32, i32, i32) {
    %c0_i32 = arith.constant 0 : i32
    %c0_i32_0 = arith.constant 0 : i32
    %c0_i32_1 = arith.constant 0 : i32
    %c0_i32_2 = arith.constant 0 : i32
    return %c0_i32, %c0_i32_0, %c0_i32_1 : i32, i32, i32
  }
  func.func @transform_2(%arg0: i32) -> (i32, i32) {
    %c0_i32 = arith.constant 0 : i32
    %c0_i32_0 = arith.constant 0 : i32
    %c0_i32_1 = arith.constant 0 : i32
    return %c0_i32, %c0_i32_0 : i32, i32
  }
  func.func @transform_3(%arg0: i32) -> (i32, i32) {
    %c0_i32 = arith.constant 0 : i32
    %c0_i32_0 = arith.constant 0 : i32
    %c0_i32_1 = arith.constant 0 : i32
    return %c0_i32, %c0_i32_0 : i32, i32
  }
  func.func @transform_4(%arg0: i32) -> (i32, i32) {
    %c0_i32 = arith.constant 0 : i32
    %c0_i32_0 = arith.constant 0 : i32
    %c0_i32_1 = arith.constant 0 : i32
    return %c0_i32, %c0_i32_0 : i32, i32
  }
}

</mosaic_0001>

<bundles_post_ra>
// kernel: downconv_forward.1
= control target key start
LH: loop header
LB: loop body
LE: loop exit
PB: predicated region body
PF: predicated region fallthrough
CT: control target
= control target key end

     0   :  { %vm103_vm0 = vcmask 1046528   ;;  %vm209_vm1 = vcmask 523264   ;;  %s1869_s0 = inlined_call_operand.vmem [shape: f32[2,9,9,64], index: 0, kind: input, shape index: {}]   ;;  %s1870_s1 = inlined_call_operand.vmem [shape: bf16[4,64,32], index: 1, kind: input, shape index: {}]   ;;  %s1871_s2 = inlined_call_operand.vmem [shape: f32[1,32], index: 2, kind: input, shape index: {}]   ;;  %s1872_s3 = inlined_call_operand.vmem [shape: f32[1,32], index: 3, kind: input, shape index: {}]   ;;  %s1873_s4 = inlined_call_operand.hbm [shape: f32[128,32], index: 4, kind: output, shape index: {}]  }
   0x1   :  { %v1269_v0 = vld [vmem:[%s1870_s1 + $0x38] sm:$0xff]   ;;  %v1271_v2 = vld [vmem:[%s1870_s1 + $0x30] sm:$0xff]   ;;  %v1273_v4 = vld [vmem:[%s1870_s1 + $0x28] sm:$0xff]  }
   0x2   :  { %v1270_v1 = vld [vmem:[%s1870_s1 + $0x18] sm:$0xff]   ;;  %1170 = vmatprep.subr.bf16.mxu0 %v1269_v0  ;;  %v1272_v3 = vld [vmem:[%s1870_s1 + $0x10] sm:$0xff]   ;;  %v1274_v5 = vld [vmem:[%s1870_s1 + $0x8] sm:$0xff]  }
   0x3   :  { %1194 = vmatprep.subr.bf16.mxu1 %v1270_v1  ;;  %1171 = vmatpush3.bf16.msra.mxu0 %v1269_v0  ;;  %v1275_v6 = vld [vmem:[%s1870_s1 + $0x20] sm:$0xff]   ;;  %v20_v9 = vld [vmem:[%s1869_s0 + $0x8] sm:$0x1]  ;;  %v1370_v10 = vld [vmem:[%s1869_s0 + $0x10] sm:$0xff] }
   0x4   :  { %1195 = vmatpush3.bf16.msra.mxu1 %v1270_v1  ;;  %1172 = vmatprep.subr.bf16.mxu0 %v1271_v2  ;;  %v1276_v7 = vld [vmem:[%s1870_s1] sm:$0xff]   ;;  %v22_v11 = vld [vmem:[%s1869_s0 + $0x18] sm:$0x1]  ;;  %v24_v13 = vld [vmem:[%s1869_s0 + $0x28] sm:$0x1]  ;;  %v105_v19 = vrot.slane %v20_v9, 1 }
   0x5   :  { %1196 = vmatprep.subr.bf16.mxu1 %v1272_v3  ;;  %v19_v8 = vld [vmem:[%s1869_s0] sm:$0xff]  ;;  %v1387_v16 = vld [vmem:[%s1869_s0 + $0x30] sm:$0xff]  ;;  %v26_v17 = vld [vmem:[%s1869_s0 + $0x38] sm:$0x1]  ;;  %v107_v20 = vrot.slane %v1370_v10, 1  ;;  %v108_v22 = vrot.slane %v22_v11, 1 }
   0x6   :  { %v1378_v12 = vld [vmem:[%s1869_s0 + $0x20] sm:$0xff]  ;;  %v104_v14 = vrot.slane %v19_v8, 1  ;;  %v55_v15 = vpack.c.bf16 %v1370_v10, %v19_v8  ;;  %v28_v21 = vld [vmem:[%s1869_s0 + $0x48] sm:$0x1]  ;;  %v111_v24 = vrot.slane %v24_v13, 1  ;;  %v113_v25 = vrot.slane %v1387_v16, 1 }
   0x7   :  { %1173 = vmatpush3.bf16.msra.mxu0 %v1271_v2  ;;  %v1395_v18 = vld [vmem:[%s1869_s0 + $0x40] sm:$0xff]  ;;  %v110_v23 = vrot.slane %v1378_v12, 1  ;;  %v114_v27 = vrot.slane %v26_v17, 1  ;;  %v117_v29 = vrot.slane %v28_v21, 1  ;;  %v1277_v30 = vld [vmem:[%s1870_s1 + $0x58] sm:$0xff]   ;;  %v1410_v31 = vsel %vm103_vm0, %v107_v20, %v108_v22  ;;  %v1427_v37 = vld [vmem:[%s1869_s0 + $0x50] sm:$0xff] }
   0x8   :  { %1197 = vmatpush3.bf16.msra.mxu1 %v1272_v3  ;;  %1174 = vmatprep.subr.bf16.mxu0 %v1273_v4  ;;  %v106_v26 = vsel %vm103_vm0, %v104_v14, %v105_v19  ;;  %v116_v28 = vrot.slane %v1395_v18, 1  ;;  %v56_v35 = vpack.c.bf16 %v1387_v16, %v1378_v12  ;;  %v1278_v36 = vld [vmem:[%s1870_s1 + $0x78] sm:$0xff]   ;;  %v119_v41 = vrot.slane %v1427_v37, 1  ;;  %v1441_v43 = vld [vmem:[%s1869_s0 + $0x60] sm:$0xff]  ;;  %v32_v44 = vld [vmem:[%s1869_s0 + $0x68] sm:$0x1] }
   0x9   :  { %1198 = vmatprep.subr.bf16.mxu1 %v1274_v5  ;;  %1202 = vmatprep.mubr.msk.bf16.mxu1 %vm209_vm1, %v55_v15  ;;  %v1413_v32 = vsel %vm103_vm0, %v110_v23, %v111_v24  ;;  %v1416_v33 = vsel %vm103_vm0, %v113_v25, %v114_v27  ;;  %v168_v34 = vpack.c.bf16 %v1410_v31, %v106_v26  ;;  %v30_v38 = vld [vmem:[%s1869_s0 + $0x58] sm:$0x1]  ;;  %v1449_v45 = vld [vmem:[%s1869_s0 + $0x70] sm:$0xff]  ;;  %v122_v47 = vrot.slane %v1441_v43, 1  ;;  %v1487_v60 = vld [vmem:[%s1869_s0 + $0xa0] sm:$0xff] }
   0xa   :  { %v1433_v39 = vsel %vm103_vm0, %v116_v28, %v117_v29  ;;  %v169_v40 = vpack.c.bf16 %v1416_v33, %v1413_v32  ;;  %v120_v42 = vrot.slane %v30_v38, 1  ;;  %v34_v46 = vld [vmem:[%s1869_s0 + $0x78] sm:$0x1]  ;;  %v123_v48 = vrot.slane %v32_v44, 1  ;;  %v1279_v50 = vld [vmem:[%s1870_s1 + $0x50] sm:$0xff]   ;;  %v1281_v8 = vld [vmem:[%s1870_s1 + $0x48] sm:$0xff]  }
   0xb   :  { %1175 = vmatpush3.bf16.msra.mxu0 %v1273_v4  ;;  %1178 = vmatprep.mubr.msk.bf16.mxu0 %vm209_vm1, %v168_v34  ;;  %v125_v49 = vrot.slane %v1449_v45, 1  ;;  %v57_v52 = vpack.c.bf16 %v1427_v37, %v1395_v18  ;;  %v126_v53 = vrot.slane %v34_v46, 1  ;;  %v1280_v54 = vld [vmem:[%s1870_s1 + $0x70] sm:$0xff]   ;;  %v38_v59 = vld [vmem:[%s1869_s0 + $0x98] sm:$0x1]  ;;  %v131_v0 = vrot.slane %v1487_v60, 1 }
   0xc   :  { %1199 = vmatpush3.bf16.msra.mxu1 %v1274_v5  ;;  %1176 = vmatprep.subr.bf16.mxu0 %v1275_v6  ;;  %v1461_v51 = vsel %vm103_vm0, %v119_v41, %v120_v42  ;;  %v1472_v56 = vsel %vm103_vm0, %v122_v47, %v123_v48  ;;  %v37_v57 = vld [vmem:[%s1869_s0 + $0x90] sm:$0xff]  ;;  %v40_v61 = vld [vmem:[%s1869_s0 + $0xa8] sm:$0x1]  ;;  %v129_v63 = vrot.slane %v38_v59, 1  ;;  %v42_v3 = vld [vmem:[%s1869_s0 + $0xb8] sm:$0x1]  ;;  %v58_v15 = vpack.c.bf16 %v1449_v45, %v1441_v43 }
   0xd   :  { %1200 = vmatprep.subr.bf16.mxu1 %v1276_v7  ;;  %v170_v55 = vpack.c.bf16 %v1461_v51, %v1433_v39  ;;  %v1479_v58 = vsel %vm103_vm0, %v125_v49, %v126_v53  ;;  %v128_v62 = vrot.slane %v37_v57, 1  ;;  %v132_v1 = vrot.slane %v40_v61, 1  ;;  %v1497_v2 = vld [vmem:[%s1869_s0 + $0xb0] sm:$0xff]  ;;  %v1508_v5 = vld [vmem:[%s1869_s0 + $0xc0] sm:$0xff]  ;;  %v1282_v20 = vld [vmem:[%s1870_s1 + $0x68] sm:$0xff]  }
   0xe   :  { %v171_v4 = vpack.c.bf16 %v1479_v58, %v1472_v56  ;;  %v135_v13 = vrot.slane %v42_v3, 1  ;;  %v137_v14 = vrot.slane %v1508_v5, 1  ;;  %v59_v21 = vpack.c.bf16 %v1487_v60, %v37_v57  ;;  %v1532_v22 = vld [vmem:[%s1869_s0 + $0xd0] sm:$0xff]  ;;  %v46_v23 = vld [vmem:[%s1869_s0 + $0xd8] sm:$0x1]  ;;  %v1540_v24 = vld [vmem:[%s1869_s0 + $0xe0] sm:$0xff] }
   0xf   :  { %1177 = vmatpush3.bf16.msra.mxu0 %v1275_v6  ;;  %v44_v6 = vld [vmem:[%s1869_s0 + $0xc8] sm:$0x1]  ;;  %v130_v9 = vsel %vm103_vm0, %v128_v62, %v129_v63  ;;  %v1519_v11 = vsel %vm103_vm0, %v131_v0, %v132_v1  ;;  %v140_v26 = vrot.slane %v1532_v22, 1  ;;  %v141_v27 = vrot.slane %v46_v23, 1  ;;  %v50_v34 = vld [vmem:[%s1869_s0 + $0xf8] sm:$0x1] }
  0x10   :  { %1201 = vmatpush3.bf16.msra.mxu1 %v1276_v7  ;;  %1218 = vmatprep.subr.bf16.mxu0 %v1277_v30  ;;  %v134_v7 = vrot.slane %v1497_v2, 1  ;;  %v172_v17 = vpack.c.bf16 %v1519_v11, %v130_v9  ;;  %v138_v19 = vrot.slane %v44_v6, 1  ;;  %v48_v25 = vld [vmem:[%s1869_s0 + $0xe8] sm:$0x1]  ;;  %v143_v28 = vrot.slane %v1540_v24, 1  ;;  %v1283_v41 = vld [vmem:[%s1870_s1 + $0x40] sm:$0xff]  }
  0x11   :  { %1242 = vmatprep.subr.bf16.mxu1 %v1278_v36  ;;  %v144_v29 = vrot.slane %v48_v25, 1  ;;  %v142_v42 = vsel %vm103_vm0, %v140_v26, %v141_v27  ;;  %v1284_v46 = vld [vmem:[%s1870_s1 + $0x60] sm:$0xff]   ;;  %v60_v48 = vpack.c.bf16 %v1508_v5, %v1497_v2 }
  0x12   :  { %1179 = vmatmul.mubr.msk.bf16.vlgmr.msra.gmra.mxu0 %vm209_vm1, %v169_v40  ;;  %v1565_v38 = vsel %vm103_vm0, %v137_v14, %v138_v19  ;;  %v52_v40 = vld [vmem:[%s1869_s0 + $0x108] sm:$0x1] }
  0x13   :  { %1203 = vmatmul.mubr.msk.bf16.vlgmr.msra.gmra.mxu1 %vm209_vm1, %v56_v35  ;;  %1219 = vmatpush3.bf16.msra.mxu0 %v1277_v30  ;;  %v1551_v30 = vld [vmem:[%s1869_s0 + $0xf0] sm:$0xff]  ;;  %v1559_v35 = vld [vmem:[%s1869_s0 + $0x100] sm:$0xff]  ;;  %v1576_v44 = vsel %vm103_vm0, %v143_v28, %v144_v29 }
  0x14   :  { %1243 = vmatpush3.bf16.msra.mxu1 %v1278_v36  ;;  %1182 = vmatprep.mubr.msk.bf16.mxu0 %vm209_vm1, %v170_v55  ;;  %v136_v36 = vsel %vm103_vm0, %v134_v7, %v135_v13  ;;  %v146_v49 = vrot.slane %v1551_v30, 1  ;;  %v149_v53 = vrot.slane %v1559_v35, 1 }
  0x15   :  { %1206 = vmatprep.mubr.msk.bf16.mxu1 %vm209_vm1, %v57_v52  ;;  %1220 = vmatprep.subr.bf16.mxu0 %v1279_v50  ;;  %v173_v47 = vpack.c.bf16 %v1565_v38, %v136_v36  ;;  %v147_v52 = vrot.slane %v50_v34, 1 }
  0x16   :  { %1244 = vmatprep.subr.bf16.mxu1 %v1280_v54 }
  0x17   :  { %1221 = vmatpush3.bf16.msra.mxu0 %v1279_v50  ;;  %v174_v50 = vpack.c.bf16 %v1576_v44, %v142_v42 }
  0x18   :  { %1245 = vmatpush3.bf16.msra.mxu1 %v1280_v54  ;;  %1222 = vmatprep.subr.bf16.mxu0 %v1281_v8  ;;  %v150_v54 = vrot.slane %v52_v40, 1 }
  0x19   :  { %1246 = vmatprep.subr.bf16.mxu1 %v1282_v20 }
  0x1a   :  { %1183 = vmatmul.mubr.msk.bf16.gmra.mxu0 %vm209_vm1, %v171_v4 }
  0x1b   :  { %1207 = vmatmul.mubr.msk.bf16.gmra.mxu1 %vm209_vm1, %v58_v15  ;;  %1186 = vmatprep.mubr.msk.bf16.mxu0 %vm209_vm1, %v172_v17 }
  0x1c   :  { %1210 = vmatprep.mubr.msk.bf16.mxu1 %vm209_vm1, %v59_v21  ;;  %1223 = vmatpush3.bf16.msra.mxu0 %v1281_v8 }
  0x1d   :  { %1247 = vmatpush3.bf16.msra.mxu1 %v1282_v20  ;;  %1224 = vmatprep.subr.bf16.mxu0 %v1283_v41 }
  0x1e   :  { %1248 = vmatprep.subr.bf16.mxu1 %v1284_v46 }
  0x1f   :  { %9 = vsyncpa [#allocation3], 0  ;;  %v61_v55 = vpack.c.bf16 %v1540_v24, %v1532_v22  ;;  %v148_v57 = vsel %vm103_vm0, %v146_v49, %v147_v52  ;;  %v151_v59 = vsel %vm103_vm0, %v149_v53, %v150_v54  ;;  %v62_v62 = vpack.c.bf16 %v1559_v35, %v1551_v30  ;;  %v35_v1 = vld [vmem:[%s1869_s0 + $0x80] sm:$0xff]  ;;  %v36_v3 = vld [vmem:[%s1869_s0 + $0x88] sm:$0x1] }
  0x20   :  { %1225 = vmatpush3.bf16.msra.mxu0 %v1283_v41  ;;  %v175_v61 = vpack.c.bf16 %v151_v59, %v148_v57  ;;  %v476_v63 = vpack.c.bf16 %v1378_v12, %v1370_v10  ;;  %v666_v0 = vpack.c.bf16 %v1413_v32, %v1410_v31  ;;  %v477_v10 = vpack.c.bf16 %v1395_v18, %v1387_v16 }
  0x21   :  { %1249 = vmatpush3.bf16.msra.mxu1 %v1284_v46  ;;  %v667_v12 = vpack.c.bf16 %v1433_v39, %v1416_v33  ;;  %v478_v31 = vpack.c.bf16 %v1441_v43, %v1427_v37  ;;  %v668_v32 = vpack.c.bf16 %v1472_v56, %v1461_v51  ;;  %v658_v4 = vrot.slane %v35_v1, 1  ;;  %v53_v43 = vld [vmem:[%s1869_s0 + $0x110] sm:$0xff] }
  0x22   :  { %1187 = vmatmul.mubr.msk.bf16.gmra.mxu0 %vm209_vm1, %v173_v47  ;;  %v659_v6 = vrot.slane %v36_v3, 1  ;;  %v479_v18 = vpack.c.bf16 %v35_v1, %v1449_v45  ;;  %v480_v37 = vpack.c.bf16 %v1497_v2, %v1487_v60  ;;  %v670_v39 = vpack.c.bf16 %v136_v36, %v1519_v11  ;;  %v54_v45 = vld [vmem:[%s1869_s0 + $0x118] sm:$0x1] }
  0x23   :  { %1211 = vmatmul.mubr.msk.bf16.gmra.mxu1 %vm209_vm1, %v60_v48  ;;  %1190 = vmatprep.mubr.msk.bf16.mxu0 %vm209_vm1, %v174_v50  ;;  %v481_v51 = vpack.c.bf16 %v1532_v22, %v1508_v5  ;;  %v671_v56 = vpack.c.bf16 %v142_v42, %v1565_v38  ;;  %v672_v60 = vpack.c.bf16 %v148_v57, %v1576_v44  ;;  %v661_v2 = vrot.slane %v53_v43, 1 }
  0x24   :  { %1214 = vmatprep.mubr.msk.bf16.mxu1 %vm209_vm1, %v61_v55  ;;  %v660_v16 = vsel %vm103_vm0, %v658_v4, %v659_v6  ;;  %v662_v7 = vrot.slane %v54_v45, 1  ;;  %v483_v5 = vpack.c.bf16 %v53_v43, %v1559_v35  ;;  %vm844_vm2 = vcmask 261120  }
  0x25   :  { %v669_v33 = vpack.c.bf16 %v660_v16, %v1479_v58  ;;  %v482_v58 = vpack.c.bf16 %v1551_v30, %v1540_v24 }
  0x26   :  { %v663_v8 = vsel %vm103_vm0, %v661_v2, %v662_v7 }
  0x27   :  { %v673_v9 = vpack.c.bf16 %v663_v8, %v151_v59 }
  0x2a   :  { %1191 = vmatmul.mubr.msk.bf16.gmra.mxu0 %vm209_vm1, %v175_v61 }
  0x2b   :  { %1215 = vmatmul.mubr.msk.bf16.gmra.mxu1 %vm209_vm1, %v62_v62  ;;  %1226 = vmatprep.mubr.msk.bf16.mxu0 %vm209_vm1, %v476_v63 }
  0x2c   :  { %1250 = vmatprep.mubr.msk.bf16.mxu1 %vm209_vm1, %v666_v0 }
  0x32   :  { %1227 = vmatmul.mubr.msk.bf16.vlgmr.msra.gmra.mxu0 %vm209_vm1, %v477_v10 }
  0x33   :  { %1251 = vmatmul.mubr.msk.bf16.vlgmr.msra.gmra.mxu1 %vm209_vm1, %v667_v12  ;;  %1230 = vmatprep.mubr.msk.bf16.mxu0 %vm209_vm1, %v478_v31 }
  0x34   :  { %1254 = vmatprep.mubr.msk.bf16.mxu1 %vm209_vm1, %v668_v32 }
  0x3a   :  { %1231 = vmatmul.mubr.msk.bf16.gmra.mxu0 %vm209_vm1, %v479_v18 }
  0x3b   :  { %1255 = vmatmul.mubr.msk.bf16.gmra.mxu1 %vm209_vm1, %v669_v33  ;;  %1234 = vmatprep.mubr.msk.bf16.mxu0 %vm209_vm1, %v480_v37 }
  0x3c   :  { %1258 = vmatprep.mubr.msk.bf16.mxu1 %vm209_vm1, %v670_v39 }
  0x42   :  { %1235 = vmatmul.mubr.msk.bf16.gmra.mxu0 %vm209_vm1, %v481_v51 }
  0x43   :  { %1259 = vmatmul.mubr.msk.bf16.gmra.mxu1 %vm209_vm1, %v671_v56  ;;  %1238 = vmatprep.mubr.msk.bf16.mxu0 %vm209_vm1, %v482_v58 }
  0x44   :  { %1262 = vmatprep.mubr.msk.bf16.mxu1 %vm209_vm1, %v672_v60 }
  0x4a   :  { %1239 = vmatmul.mubr.msk.bf16.gmra.mxu0 %vm209_vm1, %v483_v5 }
  0x4b   :  { %1263 = vmatmul.mubr.msk.bf16.gmra.mxu1 %vm209_vm1, %v673_v9 }
  0xd2   :  { %v1180_v11 = vpop.f32.mrf.mxu0 }
  0xd3   :  { %v1204_v13 = vpop.f32.mrf.mxu1 }
  0xd4   :  { %v268_v14 = vpop.f32.mrf.mxu0  ;;  %v422_v61 = vadd.f32 %v1204_v13, %v1180_v11 }
  0xd5   :  { %v413_v15 = vpop.f32.mrf.mxu1 }
  0xd6   :  { %v1181_v17 = vpop.f32.mrf.mxu0  ;;  %v414_v55 = vadd.f32 %v413_v15, %v268_v14 }
  0xd7   :  { %v1205_v19 = vpop.f32.mrf.mxu1 }
  0xd8   :  { %v271_v20 = vpop.f32.mrf.mxu0  ;;  %v425_v1 = vadd.f32 %v1205_v19, %v1181_v17 }
  0xd9   :  { %v416_v21 = vpop.f32.mrf.mxu1 }
  0xda   :  { %v1184_v22 = vpop.f32.mrf.mxu0  ;;  %v417_v3 = vadd.f32 %v416_v21, %v271_v20 }
  0xdb   :  { %v1208_v23 = vpop.f32.mrf.mxu1 }
  0xdc   :  { %v284_v24 = vpop.f32.mrf.mxu0  ;;  %v438_v45 = vadd.f32 %v1208_v23, %v1184_v22 }
  0xdd   :  { %v429_v25 = vpop.f32.mrf.mxu1 }
  0xde   :  { %v1185_v26 = vpop.f32.mrf.mxu0  ;;  %v430_v33 = vadd.f32 %v429_v25, %v284_v24 }
  0xdf   :  { %v1209_v27 = vpop.f32.mrf.mxu1 }
  0xe0   :  { %v287_v28 = vpop.f32.mrf.mxu0  ;;  %v441_v8 = vadd.f32 %v1209_v27, %v1185_v26 }
  0xe1   :  { %v432_v29 = vpop.f32.mrf.mxu1 }
  0xe2   :  { %v1653_v30 = vpop.f32.mrf.mxu0  ;;  %v433_v11 = vadd.f32 %v432_v29, %v287_v28 }
  0xe3   :  { %v1655_v34 = vpop.f32.mrf.mxu1 }
  0xe4   :  { %v300_v35 = vpop.f32.mrf.mxu0 }
  0xe5   :  { %v445_v36 = vpop.f32.mrf.mxu1 }
  0xe6   :  { %v1657_v38 = vpop.f32.mrf.mxu0  ;;  %v446_v27 = vadd.f32 %v445_v36, %v300_v35 }
  0xe7   :  { %v1659_v40 = vpop.f32.mrf.mxu1 }
  0xe8   :  { %v1661_v41 = vpop.f32.mrf.mxu0  ;;  %v457_v36 = vadd.f32 %v1659_v40, %v1657_v38 }
  0xe9   :  { %v1663_v42 = vpop.f32.mrf.mxu1 }
  0xea   :  { %v1665_v44 = vpop.f32.mrf.mxu0 }
  0xeb   :  { %v1667_v46 = vpop.f32.mrf.mxu1 }
  0xec   :  { %v1669_v47 = vpop.f32.mrf.mxu0 }
  0xed   :  { %v1671_v48 = vpop.f32.mrf.mxu1 }
  0xee   :  { %v1673_v49 = vpop.f32.mrf.mxu0 }
  0xef   :  { %v1675_v50 = vpop.f32.mrf.mxu1 }
  0xf0   :  { %v1677_v52 = vpop.f32.mrf.mxu0 }
  0xf1   :  { %v1679_v53 = vpop.f32.mrf.mxu1 }
  0xf2   :  { %v1228_v54 = vpop.f32.mrf.mxu0 }
  0xf3   :  { %v1252_v57 = vpop.f32.mrf.mxu1  ;;  %v640_v10 = vadd.f32 %v1228_v54, %v422_v61  ;;  %v454_v61 = vadd.f32 %v1655_v34, %v1653_v30 }
  0xf4   :  { %v575_v59 = vpop.f32.mrf.mxu0 }
  0xf5   :  { %v638_v62 = vadd.f32 %v575_v59, %v414_v55  ;;  %v765_v63 = vpop.f32.mrf.mxu1  ;;  %v1683_v37 = vadd.f32 %v1252_v57, %v640_v10  ;;  %v449_v10 = vadd.f32 %v1663_v42, %v1661_v41  ;;  %v462_v41 = vadd.f32 %v1671_v48, %v1669_v47 }
  0xf6   :  { %v1229_v0 = vpop.f32.mrf.mxu0  ;;  %v473_v48 = vadd.f32 %v1675_v50, %v1673_v49 }
  0xf7   :  { %v1253_v12 = vpop.f32.mrf.mxu1  ;;  %v1681_v32 = vadd.f32 %v765_v63, %v638_v62  ;;  %v641_v4 = vadd.f32 %v1229_v0, %v425_v1  ;;  %v848_v13 = vsel %vm844_vm2, %v1683_v37, 0.0 }
  0xf8   :  { %v578_v31 = vpop.f32.mrf.mxu0 }
  0xf9   :  { %v639_v6 = vadd.f32 %v578_v31, %v417_v3  ;;  %v768_v16 = vpop.f32.mrf.mxu1  ;;  %v845_v56 = vsel %vm844_vm2, %v1681_v32, 0.0  ;;  %v1689_v58 = vadd.f32 %v1253_v12, %v641_v4 }
  0xfa   :  { %v1232_v18 = vpop.f32.mrf.mxu0 }
  0xfb   :  { %v1685_v39 = vadd.f32 %v768_v16, %v639_v6  ;;  %v1256_v43 = vpop.f32.mrf.mxu1  ;;  %v644_v14 = vadd.f32 %v1232_v18, %v438_v45  ;;  %v850_v21 = vsel %vm844_vm2, %v1689_v58, 0.0 }
  0xfc   :  { %v591_v51 = vpop.f32.mrf.mxu0 }
  0xfd   :  { %v846_v60 = vsel %vm844_vm2, %v1685_v39, 0.0  ;;  %v642_v2 = vadd.f32 %v591_v51, %v430_v33  ;;  %v781_v7 = vpop.f32.mrf.mxu1  ;;  %v1699_v54 = vadd.f32 %v1256_v43, %v644_v14  ;;  %v465_v14 = vadd.f32 %v1679_v53, %v1677_v52 }
  0xfe   :  { %v847_v5 = vadd.f32 %v846_v60, %v845_v56  ;;  %v1233_v9 = vpop.f32.mrf.mxu0 }
  0xff   :  { %v1695_v15 = vadd.f32 %v781_v7, %v642_v2  ;;  %v1257_v17 = vpop.f32.mrf.mxu1  ;;  %v645_v22 = vadd.f32 %v1233_v9, %v441_v8  ;;  %v856_v12 = vsel %vm844_vm2, %v1699_v54, 0.0  ;;  %v470_v7 = vadd.f32 %v1667_v46, %v1665_v44 }
 0x100   :  { %v849_v19 = vadd.f32 %v848_v13, %v847_v5  ;;  %v594_v20 = vpop.f32.mrf.mxu0 }
 0x101   :  { %v643_v23 = vadd.f32 %v594_v20, %v433_v11  ;;  %v784_v24 = vpop.f32.mrf.mxu1  ;;  %v852_v28 = vsel %vm844_vm2, %v1695_v15, 0.0  ;;  %v1707_v62 = vadd.f32 %v1257_v17, %v645_v22 }
 0x102   :  { %v851_v25 = vadd.f32 %v850_v21, %v849_v19  ;;  %v1236_v26 = vpop.f32.mrf.mxu0 }
 0x103   :  { %v1703_v29 = vadd.f32 %v784_v24, %v643_v23  ;;  %v1260_v55 = vpop.f32.mrf.mxu1  ;;  %v648_v31 = vadd.f32 %v1236_v26, %v454_v61  ;;  %v858_v16 = vsel %vm844_vm2, %v1707_v62, 0.0 }
 0x104   :  { %v853_v57 = vadd.f32 %v852_v28, %v851_v25  ;;  %v607_v59 = vpop.f32.mrf.mxu0 }
 0x105   :  { %v854_v63 = vsel %vm844_vm2, %v1703_v29, 0.0  ;;  %v646_v0 = vadd.f32 %v607_v59, %v446_v27  ;;  %v797_v35 = vpop.f32.mrf.mxu1  ;;  %v1723_v42 = vadd.f32 %v1260_v55, %v648_v31 }
 0x106   :  { %v855_v1 = vadd.f32 %v854_v63, %v853_v57  ;;  %v1237_v3 = vpop.f32.mrf.mxu0 }
 0x107   :  { %v1717_v30 = vadd.f32 %v797_v35, %v646_v0  ;;  %v1261_v34 = vpop.f32.mrf.mxu1  ;;  %v649_v18 = vadd.f32 %v1237_v3, %v457_v36  ;;  %v864_v17 = vsel %vm844_vm2, %v1723_v42, 0.0 }
 0x108   :  { %v857_v4 = vadd.f32 %v856_v12, %v855_v1  ;;  %v610_v6 = vpop.f32.mrf.mxu0 }
 0x109   :  { %v647_v33 = vadd.f32 %v610_v6, %v449_v10  ;;  %v800_v38 = vpop.f32.mrf.mxu1  ;;  %v860_v45 = vsel %vm844_vm2, %v1717_v30, 0.0  ;;  %v1731_v8 = vadd.f32 %v1261_v34, %v649_v18 }
 0x10a   :  { %v859_v40 = vadd.f32 %v858_v16, %v857_v4  ;;  %v1240_v43 = vpop.f32.mrf.mxu0 }
 0x10b   :  { %v1727_v51 = vadd.f32 %v800_v38, %v647_v33  ;;  %v1264_v56 = vpop.f32.mrf.mxu1  ;;  %v652_v19 = vadd.f32 %v1240_v43, %v470_v7  ;;  %v866_v22 = vsel %vm844_vm2, %v1731_v8, 0.0 }
 0x10c   :  { %v861_v60 = vadd.f32 %v860_v45, %v859_v40  ;;  %v623_v2 = vpop.f32.mrf.mxu0 }
 0x10d   :  { %v862_v5 = vsel %vm844_vm2, %v1727_v51, 0.0  ;;  %v650_v9 = vadd.f32 %v623_v2, %v462_v41  ;;  %v813_v47 = vpop.f32.mrf.mxu1  ;;  %v1745_v25 = vadd.f32 %v1264_v56, %v652_v19 }
 0x10e   :  { %v863_v11 = vadd.f32 %v862_v5, %v861_v60  ;;  %v1241_v13 = vpop.f32.mrf.mxu0 }
 0x10f   :  { %v1741_v44 = vadd.f32 %v813_v47, %v650_v9  ;;  %v1265_v46 = vpop.f32.mrf.mxu1  ;;  %v653_v23 = vadd.f32 %v1241_v13, %v473_v48  ;;  %v872_v57 = vsel %vm844_vm2, %v1745_v25, 0.0 }
 0x110   :  { %v865_v20 = vadd.f32 %v864_v17, %v863_v11  ;;  %v626_v21 = vpop.f32.mrf.mxu0 }
 0x111   :  { %v651_v24 = vadd.f32 %v626_v21, %v465_v14  ;;  %v816_v50 = vpop.f32.mrf.mxu1  ;;  %v868_v52 = vsel %vm844_vm2, %v1741_v44, 0.0  ;;  %v1749_v27 = vadd.f32 %v1265_v46, %v653_v23 }
 0x112   :  { %v867_v49 = vadd.f32 %v866_v22, %v865_v20 }
 0x113   :  { %v841_v53 = vadd.f32 %v816_v50, %v651_v24  ;;  %v874_v61 = vsel %vm844_vm2, %v1749_v27, 0.0 }
 0x114   :  { %v869_v26 = vadd.f32 %v868_v52, %v867_v49 }
 0x115   :  { %v870_v28 = vsel %vm844_vm2, %v841_v53, 0.0 }
 0x116   :  { %v871_v55 = vadd.f32 %v870_v28, %v869_v26 }
 0x118   :  { %v873_v59 = vadd.f32 %v872_v57, %v871_v55 }
 0x11a   :  { %v875_v63 = vadd.f32 %v874_v61, %v873_v59 }
 0x11c   :  { %v876_v0 = vrot.slane %v875_v63, 4 }
 0x11e   :  { %v877_v35 = vadd.f32 %v876_v0, %v875_v63 }
 0x120   :  { %v878_v36 = vrot.slane %v877_v35, 2 }
 0x122   :  { %v879_v1 = vadd.f32 %v878_v36, %v877_v35 }
 0x124   :  { %v880_v3 = vrot.slane %v879_v1, 1 }
 0x126   :  { %v881_v10 = vadd.f32 %v880_v3, %v879_v1 }
 0x128   :  { %v883_v12 = vmul.f32 0.0078125, %v881_v10 }
 0x12a   :  { %v1757_v31 = vsub.f32 %v1681_v32, %v883_v12  ;;  %v1760_v34 = vsub.f32 %v1685_v39, %v883_v12  ;;  %v1763_v4 = vsub.f32 %v1683_v37, %v883_v12  ;;  %v1766_v6 = vsub.f32 %v1689_v58, %v883_v12 }
 0x12b   :  { %v1773_v33 = vsub.f32 %v1695_v15, %v883_v12  ;;  %v1778_v39 = vsub.f32 %v1703_v29, %v883_v12  ;;  %v1785_v43 = vsub.f32 %v1699_v54, %v883_v12  ;;  %v1791_v29 = vsub.f32 %v1707_v62, %v883_v12 }
 0x12c   :  { %v900_v16 = vmul.f32 %v1757_v31, %v1757_v31  ;;  %v901_v18 = vmul.f32 %v1760_v34, %v1760_v34  ;;  %v902_v32 = vmul.f32 %v1763_v4, %v1763_v4  ;;  %v903_v37 = vmul.f32 %v1766_v6, %v1766_v6 }
 0x12d   :  { %v904_v15 = vmul.f32 %v1773_v33, %v1773_v33  ;;  %v905_v56 = vmul.f32 %v1778_v39, %v1778_v39  ;;  %v1797_v7 = vsub.f32 %v1717_v30, %v883_v12  ;;  %v906_v54 = vmul.f32 %v1785_v43, %v1785_v43 }
 0x12e   :  { %v916_v58 = vsel %vm844_vm2, %v900_v16, 0.0  ;;  %v917_v38 = vsel %vm844_vm2, %v901_v18, 0.0  ;;  %v919_v41 = vsel %vm844_vm2, %v902_v32, 0.0  ;;  %v921_v60 = vsel %vm844_vm2, %v903_v37, 0.0 }
 0x12f   :  { %v918_v40 = vadd.f32 %v917_v38, %v916_v58  ;;  %v923_v5 = vsel %vm844_vm2, %v904_v15, 0.0  ;;  %v1803_v47 = vsub.f32 %v1727_v51, %v883_v12  ;;  %v907_v62 = vmul.f32 %v1791_v29, %v1791_v29 }
 0x130   :  { %v925_v48 = vsel %vm844_vm2, %v905_v56, 0.0  ;;  %v894_v13 = vsub.f32 %v1723_v42, %v883_v12  ;;  %v908_v30 = vmul.f32 %v1797_v7, %v1797_v7  ;;  %v927_v14 = vsel %vm844_vm2, %v906_v54, 0.0 }
 0x131   :  { %v920_v45 = vadd.f32 %v919_v41, %v918_v40  ;;  %v895_v19 = vsub.f32 %v1731_v8, %v883_v12  ;;  %v909_v51 = vmul.f32 %v1803_v47, %v1803_v47  ;;  %v929_v46 = vsel %vm844_vm2, %v907_v62, 0.0 }
 0x132   :  { %v896_v21 = vsub.f32 %v1741_v44, %v883_v12  ;;  %v910_v22 = vmul.f32 %v894_v13, %v894_v13  ;;  %v931_v23 = vsel %vm844_vm2, %v908_v30, 0.0  ;;  %v897_v24 = vsub.f32 %v841_v53, %v883_v12 }
 0x133   :  { %v922_v2 = vadd.f32 %v921_v60, %v920_v45  ;;  %v911_v49 = vmul.f32 %v895_v19, %v895_v19  ;;  %v933_v50 = vsel %vm844_vm2, %v909_v51, 0.0  ;;  %v898_v26 = vsub.f32 %v1745_v25, %v883_v12  ;;  %v956_v45 = vld [vmem:[%s1871_s2] sm:$0x1] }
 0x134   :  { %v912_v8 = vmul.f32 %v896_v21, %v896_v21  ;;  %v935_v28 = vsel %vm844_vm2, %v910_v22, 0.0  ;;  %v899_v57 = vsub.f32 %v1749_v27, %v883_v12  ;;  %v913_v59 = vmul.f32 %v897_v24, %v897_v24  ;;  %v1121_v51 = vld [vmem:[%s1872_s3] ss:$0 sm:$0xff]  ;;  %s1309_s3 = smov [#allocation2]  }
 0x135   :  { %v924_v9 = vadd.f32 %v923_v5, %v922_v2  ;;  %v937_v44 = vsel %vm844_vm2, %v911_v49, 0.0  ;;  %v914_v63 = vmul.f32 %v898_v26, %v898_v26  ;;  %v958_v15 = vlaneseq  ;;  %s1038_s16 = sshll.u32 %s1309_s3, 4  ;;  %s1847_s16 = int_to_ptr.vmem [resolvable:$true] %s1038_s16 }
 0x136   :  { %v939_v0 = vsel %vm844_vm2, %v912_v8, 0.0  ;;  %v915_v35 = vmul.f32 %v899_v57, %v899_v57  ;;  %v941_v36 = vsel %vm844_vm2, %v913_v59, 0.0  ;;  %s1287_s17 = scalar_lea.vmem %s1847_s16, 2048  ;;  %p1292_p1 = scmp.lt.s32.totalorder %s1847_s16, %s1847_s16 }
 0x137   :  { %v926_v11 = vadd.f32 %v925_v48, %v924_v9  ;;  %v943_v25 = vsel %vm844_vm2, %v914_v63, 0.0  ;;  %v959_v41 = vshrl.u32 %v958_v15, 7  ;;  %p1288_p0 = scmp.ne.s32.totalorder %s1847_s16, %s1287_s17  ;;  %p1293_p2 = scmp.lt.s32.totalorder %s1287_s17, %s1287_s17 }
 0x138   :  { %v945_v10 = vsel %vm844_vm2, %v915_v35, 0.0 }
 0x139   :  { %v928_v17 = vadd.f32 %v927_v14, %v926_v11  ;;  %v960_v56 = vsub.s32 0, %v959_v41  ;;  %p1294_p3 = por %p1293_p2, %p1292_p1 }
 0x13b   :  { %v930_v20 = vadd.f32 %v929_v46, %v928_v17  ;;  %p1295_p4 = pnand %p1294_p3, %p1288_p0 }
 0x13d   :  { %v932_v42 = vadd.f32 %v931_v23, %v930_v20 }
 0x13f   :  { %v934_v52 = vadd.f32 %v933_v50, %v932_v42 }
 0x141   :  { %v936_v55 = vadd.f32 %v935_v28, %v934_v52 }
 0x143   :  { %v938_v61 = vadd.f32 %v937_v44, %v936_v55 }
 0x145   :  { %v940_v53 = vadd.f32 %v939_v0, %v938_v61 }
 0x147   :  { %v942_v1 = vadd.f32 %v941_v36, %v940_v53 }
 0x149   :  { %v944_v3 = vadd.f32 %v943_v25, %v942_v1 }
 0x14b   :  { %v946_v16 = vadd.f32 %v945_v10, %v944_v3 }
 0x14d   :  { %v947_v18 = vrot.slane %v946_v16, 4 }
 0x14f   :  { %v948_v27 = vadd.f32 %v947_v18, %v946_v16 }
 0x151   :  { %v949_v12 = vrot.slane %v948_v27, 2 }
 0x153   :  { %v950_v32 = vadd.f32 %v949_v12, %v948_v27 }
 0x155   :  { %v951_v37 = vrot.slane %v950_v32, 1 }
 0x157   :  { %v952_v58 = vadd.f32 %v951_v37, %v950_v32 }
 0x159   :  { %v953_v38 = vmul.f32 0.0078125, %v952_v58 }
 0x15b   :  { %v954_v40 = vadd.f32 1e-05, %v953_v38 }
 0x15d   :  { %1285 = vrsqrt.f32 %v954_v40 }
 0x16a   :  { %v1286_v60 = vpop.eup %1285 }
 0x16b   :  { %v957_v2 = vmul.f32 %v1286_v60, %v956_v45 }
 0x16d   :  { %v961_v54 = vrot.slane %v957_v2, %v960_v56 }
 0x16f   :  { %v962_v5 = vmul.f32 %v961_v54, %v1757_v31  ;;  %v963_v9 = vmul.f32 %v961_v54, %v1760_v34  ;;  %v964_v62 = vmul.f32 %v961_v54, %v1763_v4  ;;  %v965_v48 = vmul.f32 %v961_v54, %v1766_v6 }
 0x170   :  { %v966_v11 = vmul.f32 %v961_v54, %v1773_v33  ;;  %v967_v30 = vmul.f32 %v961_v54, %v1778_v39  ;;  %v968_v14 = vmul.f32 %v961_v54, %v1785_v43  ;;  %v969_v17 = vmul.f32 %v961_v54, %v1791_v29 }
 0x171   :  { %v970_v31 = vmul.f32 %v961_v54, %v1797_v7  ;;  %v971_v34 = vmul.f32 %v961_v54, %v1803_v47  ;;  %v972_v46 = vmul.f32 %v961_v54, %v894_v13  ;;  %v973_v4 = vmul.f32 %v961_v54, %v895_v19 }
 0x172   :  { %v974_v20 = vmul.f32 %v961_v54, %v896_v21  ;;  %v975_v6 = vmul.f32 %v961_v54, %v897_v24  ;;  %v976_v22 = vmul.f32 %v961_v54, %v898_v26  ;;  %v977_v33 = vmul.f32 %v961_v54, %v899_v57 }
 0x173   :  { %v985_v23 = vadd.f32 %v1121_v51, %v962_v5  ;;  %v986_v39 = vadd.f32 %v1121_v51, %v963_v9  ;;  %v987_v42 = vadd.f32 %v1121_v51, %v964_v62  ;;  %v988_v43 = vadd.f32 %v1121_v51, %v965_v48 }
 0x174   :  { %v989_v49 = vadd.f32 %v1121_v51, %v966_v11  ;;  %v990_v29 = vadd.f32 %v1121_v51, %v967_v30  ;;  %v991_v50 = vadd.f32 %v1121_v51, %v968_v14  ;;  %v992_v52 = vadd.f32 %v1121_v51, %v969_v17 }
 0x175   :  { %v993_v8 = vadd.f32 %v1121_v51, %v970_v31  ;;  %v994_v28 = vadd.f32 %v1121_v51, %v971_v34  ;;  %v995_v55 = vadd.f32 %v1121_v51, %v972_v46  ;;  %v996_v7 = vadd.f32 %v1121_v51, %v973_v4 }
 0x176   :  { %v997_v59 = vadd.f32 %v1121_v51, %v974_v20  ;;  %v998_v47 = vadd.f32 %v1121_v51, %v975_v6  ;;  %v999_v13 = vadd.f32 %v1121_v51, %v976_v22  ;;  %v1000_v19 = vadd.f32 %v1121_v51, %v977_v33 }
 0x177   :  { %v1001_v21 = vmax.f32 %v985_v23, 0.0  ;;  %v1002_v24 = vmax.f32 %v986_v39, 0.0  ;;  %v1003_v26 = vmax.f32 %v987_v42, 0.0  ;;  %v1004_v57 = vmax.f32 %v988_v43, 0.0 }
 0x178   :  { %v1005_v44 = vmax.f32 %v989_v49, 0.0  ;;  %v1006_v61 = vmax.f32 %v990_v29, 0.0  ;;  %v1007_v63 = vmax.f32 %v991_v50, 0.0  ;;  %v1008_v0 = vmax.f32 %v992_v52, 0.0 }
 0x179   :  { %v1009_v53 = vmax.f32 %v993_v8, 0.0  ;;  %v1010_v35 = vmax.f32 %v994_v28, 0.0  ;;  %v1011_v36 = vmax.f32 %v995_v55, 0.0  ;;  %v1012_v1 = vmax.f32 %v996_v7, 0.0  ;;  %1017 = vst.msk [vmem:[#allocation2] sm:$0xff] %vm844_vm2, %v1001_v21  ;;  %1018 = vst.msk [vmem:[#allocation2 + $0x8] sm:$0xff] %vm844_vm2, %v1002_v24 }
 0x17a   :  { %1019 = vst.msk [vmem:[#allocation2 + $0x10] sm:$0xff] %vm844_vm2, %v1003_v26  ;;  %1020 = vst.msk [vmem:[#allocation2 + $0x18] sm:$0xff] %vm844_vm2, %v1004_v57  ;;  %v1013_v25 = vmax.f32 %v997_v59, 0.0  ;;  %v1014_v3 = vmax.f32 %v998_v47, 0.0  ;;  %v1015_v10 = vmax.f32 %v999_v13, 0.0  ;;  %v1016_v16 = vmax.f32 %v1000_v19, 0.0 }
 0x17b   :  { %1021 = vst.msk [vmem:[#allocation2 + $0x20] sm:$0xff] %vm844_vm2, %v1005_v44  ;;  %1022 = vst.msk [vmem:[#allocation2 + $0x28] sm:$0xff] %vm844_vm2, %v1006_v61 }
 0x17c   :  { %1023 = vst.msk [vmem:[#allocation2 + $0x30] sm:$0xff] %vm844_vm2, %v1007_v63  ;;  %1024 = vst.msk [vmem:[#allocation2 + $0x38] sm:$0xff] %vm844_vm2, %v1008_v0 }
 0x17d   :  { %1025 = vst.msk [vmem:[#allocation2 + $0x40] sm:$0xff] %vm844_vm2, %v1009_v53  ;;  %1026 = vst.msk [vmem:[#allocation2 + $0x48] sm:$0xff] %vm844_vm2, %v1010_v35 }
 0x17e   :  { %1027 = vst.msk [vmem:[#allocation2 + $0x50] sm:$0xff] %vm844_vm2, %v1011_v36  ;;  %1028 = vst.msk [vmem:[#allocation2 + $0x58] sm:$0xff] %vm844_vm2, %v1012_v1 }
 0x17f   :  { %1029 = vst.msk [vmem:[#allocation2 + $0x60] sm:$0xff] %vm844_vm2, %v1013_v25  ;;  %1030 = vst.msk [vmem:[#allocation2 + $0x68] sm:$0xff] %vm844_vm2, %v1014_v3 }
 0x180   :  { %1031 = vst.msk [vmem:[#allocation2 + $0x70] sm:$0xff] %vm844_vm2, %v1015_v10  ;;  %1032 = vst.msk [vmem:[#allocation2 + $0x78] sm:$0xff] %vm844_vm2, %v1016_v16 }
 0x181   :  { %1298 = shalt.err (!%p1295_p4)
}
 0x182   :  { %s1310_s18 = smov 128   ;;  %s1311_s19 = smov 8  }
 0x183   :  { %1044 = dma.vmem_to_hbm [thread:$0]  %s1847_s16, 2048, %s1873_s4, [#allocation3], %s1310_s18, %s1310_s18, %s1311_s19  }
 0x184   :  { %1307 = dma.done.wait [#allocation3], 2048  }
 0x185   :  { %1308 = vsyncadd [#allocation3], 4294965248 }
 0x186   :  { %1048 = vsyncpa [#allocation3], 1 }

</bundles_post_ra>
